<compile_context>
chip_gen: v7x
topology: tpu7x:2x2x1
jax: 0.10.0
libtpu: 0.0.40
codegen_flags: <defaults>
</compile_context>

<pallas_src>
import functools

import jax
import jax.numpy as jnp
from jax.experimental import pallas as pl
from jax.experimental.pallas import tpu as pltpu

_BN_EPS = 1e-5


# --------------------------------------------------------------------------- tiling


def _round_up(x, m):
    return (x + m - 1) // m * m


def _default_vmem_limit():
    """Generation-aware VMEM budget: ~3/4 of per-core VMEM, capped at 100 MiB."""
    cap = 64 * 1024 * 1024
    try:
        info = pltpu.get_tpu_info()
        cap = int(getattr(info, "vmem_capacity_bytes", cap))
    except Exception:
        pass
    return max(32 * 1024 * 1024, min(cap * 3 // 4, 100 * 1024 * 1024))


_VMEM_LIMIT = _default_vmem_limit()


def _tile_m(m):
    """M (= N*Ho*Wo) tile size + padded M. Large M keeps >=2 tiles (megacore)."""
    m8 = _round_up(m, 8)
    if m8 <= 512:
        return m8, m8
    return 512, _round_up(m8, 512)


def _tile_k(k):
    """K (= kh*kw*Cin_phys) tile size + padded K (lane-multiple contraction dim)."""
    k_pad = _round_up(k, 128)
    for tk in (512, 384, 256, 128):
        if k_pad % tk == 0:
            return tk, k_pad
    return 128, k_pad


def _tile_m_epilogue(m_pad, tm):
    """Streaming epilogue benefits from even bigger M tiles when they divide m_pad."""
    for cand in (1024, 512):
        if cand >= tm and m_pad % cand == 0:
            return cand
    return tm


def _vmem_spec():
    return pl.BlockSpec(memory_space=pltpu.MemorySpace.VMEM)


# --------------------------------------------------------------------------- kernels


@functools.lru_cache(maxsize=None)
def _get_conv_matmul(m_pad, k_pad, cout, tm, tk):
    """Tiled bf16 matmul (im2col conv) with full-Cout-resident weights.

    Outputs: bf16 pre-BN conv result + f32 per-M-tile per-channel partial sums and
    sums-of-squares for training-mode BatchNorm statistics.
    """
    n_m, n_k = m_pad // tm, k_pad // tk
    flops = 2 * m_pad * k_pad * cout
    bytes_accessed = (m_pad * k_pad * 2
                      + k_pad * cout * 2 * (n_m if n_k > 1 else 1)
                      + m_pad * cout * 2
                      + 2 * 8 * n_m * cout * 4)

    if n_k == 1:
        # Single-K-step fast path (all 1x1 convs + the stem): no accumulator scratch,
        # no pl.when phases, weights stay resident across all M tiles.
        def kernel(a_ref, w_ref, y_ref, s_ref, q_ref):
            acc = jnp.dot(a_ref[...], w_ref[...], preferred_element_type=jnp.float32)
            y_ref[...] = acc.astype(y_ref.dtype)
            part = acc.reshape(tm // 8, 8, cout)            # sublane-preserving view
            s_ref[...] = jnp.sum(part, axis=0)              # VPU-only partial sums
            q_ref[...] = jnp.sum(part * part, axis=0)

        grid = (n_m,)
        in_specs = [
            pl.BlockSpec((tm, tk), lambda i: (i, 0)),
            pl.BlockSpec((tk, cout), lambda i: (0, 0)),     # resident weights
        ]
        out_specs = [
            pl.BlockSpec((tm, cout), lambda i: (i, 0)),
            pl.BlockSpec((8, cout), lambda i: (i, 0)),
            pl.BlockSpec((8, cout), lambda i: (i, 0)),
        ]
        scratch_shapes = []
        dims = ("parallel",)
    else:
        def kernel(a_ref, w_ref, y_ref, s_ref, q_ref, acc_ref):
            @pl.when(pl.program_id(1) == 0)
            def _init():
                acc_ref[...] = jnp.zeros_like(acc_ref)

            acc_ref[...] += jnp.dot(a_ref[...], w_ref[...],
                                    preferred_element_type=jnp.float32)

            @pl.when(pl.program_id(1) == n_k - 1)
            def _finalize():
                acc = acc_ref[...]
                y_ref[...] = acc.astype(y_ref.dtype)        # bf16 store
                part = acc.reshape(tm // 8, 8, cout)
                s_ref[...] = jnp.sum(part, axis=0)
                q_ref[...] = jnp.sum(part * part, axis=0)

        grid = (n_m, n_k)
        in_specs = [
            pl.BlockSpec((tm, tk), lambda i, k: (i, k)),
            pl.BlockSpec((tk, cout), lambda i, k: (k, 0)),
        ]
        out_specs = [
            pl.BlockSpec((tm, cout), lambda i, k: (i, 0)),
            pl.BlockSpec((8, cout), lambda i, k: (i, 0)),
            pl.BlockSpec((8, cout), lambda i, k: (i, 0)),
        ]
        scratch_shapes = [pltpu.VMEM((tm, cout), jnp.float32)]
        dims = ("parallel", "arbitrary")

    call = pl.pallas_call(
        kernel,
        out_shape=(
            jax.ShapeDtypeStruct((m_pad, cout), jnp.bfloat16),    # pre-BN conv out
            jax.ShapeDtypeStruct((8 * n_m, cout), jnp.float32),   # partial sums
            jax.ShapeDtypeStruct((8 * n_m, cout), jnp.float32),   # partial sum-sq
        ),
        grid_spec=pltpu.PrefetchScalarGridSpec(
            num_scalar_prefetch=0,
            grid=grid,
            in_specs=in_specs,
            out_specs=out_specs,
            scratch_shapes=scratch_shapes,
        ),
        compiler_params=pltpu.CompilerParams(
            dimension_semantics=dims,
            vmem_limit_bytes=_VMEM_LIMIT),
        cost_estimate=pl.CostEstimate(
            flops=flops, transcendentals=0, bytes_accessed=bytes_accessed),
    )
    return jax.jit(call)


@functools.lru_cache(maxsize=None)
def _get_bn_epilogue(m_pad, cout, tm, relu, residual):
    """Tiled epilogue: f32(y)*scale + shift [+ residual] [+ ReLU], bf16 store."""
    n_m = m_pad // tm

    def kernel(*refs):
        if residual:
            y_ref, sc_ref, sh_ref, r_ref, o_ref = refs
        else:
            y_ref, sc_ref, sh_ref, o_ref = refs
            r_ref = None
        y = y_ref[...].astype(jnp.float32) * sc_ref[...] + sh_ref[...]
        if r_ref is not None:
            y = y + r_ref[...].astype(jnp.float32)
        if relu:
            y = jnp.maximum(y, 0.0)
        o_ref[...] = y.astype(o_ref.dtype)

    in_specs = [
        pl.BlockSpec((tm, cout), lambda i: (i, 0)),
        pl.BlockSpec((1, cout), lambda i: (0, 0)),
        pl.BlockSpec((1, cout), lambda i: (0, 0)),
    ]
    if residual:
        in_specs.append(pl.BlockSpec((tm, cout), lambda i: (i, 0)))

    call = pl.pallas_call(
        kernel,
        out_shape=jax.ShapeDtypeStruct((m_pad, cout), jnp.bfloat16),
        grid_spec=pltpu.PrefetchScalarGridSpec(
            num_scalar_prefetch=0,
            grid=(n_m,),
            in_specs=in_specs,
            out_specs=pl.BlockSpec((tm, cout), lambda i: (i, 0)),
        ),
        compiler_params=pltpu.CompilerParams(
            dimension_semantics=("parallel",),
            vmem_limit_bytes=_VMEM_LIMIT),
    )
    return jax.jit(call)


@functools.lru_cache(maxsize=None)
def _get_avgpool(n, hw, c):
    """AdaptiveAvgPool2d((1, 1)): mean over the spatial axis (small tensor)."""

    def kernel(x_ref, o_ref):
        o_ref[...] = jnp.mean(x_ref[...].astype(jnp.float32), axis=1)

    call = pl.pallas_call(
        kernel,
        out_shape=jax.ShapeDtypeStruct((n, c), jnp.float32),
        in_specs=[_vmem_spec()],
        out_specs=_vmem_spec(),
        compiler_params=pltpu.CompilerParams(vmem_limit_bytes=_VMEM_LIMIT),
    )
    return jax.jit(call)


@functools.lru_cache(maxsize=None)
def _get_fc(n, k, c):
    """Final Linear layer: x @ W + b (tiny)."""

    def kernel(x_ref, w_ref, b_ref, o_ref):
        o_ref[...] = (
            jnp.dot(x_ref[...], w_ref[...], preferred_element_type=jnp.float32)
            + b_ref[...]
        )

    call = pl.pallas_call(
        kernel,
        out_shape=jax.ShapeDtypeStruct((n, c), jnp.float32),
        in_specs=[_vmem_spec() for _ in range(3)],
        out_specs=_vmem_spec(),
        compiler_params=pltpu.CompilerParams(vmem_limit_bytes=_VMEM_LIMIT),
    )
    return jax.jit(call)


# ----------------------------------------------------------------------- JAX glue ops


def _im2col(x, kh, kw, stride, pad):
    """x: (N, H, W, C) -> ((N*Ho*Wo, kh*kw*C), Ho, Wo), (kh, kw, c) minor ordering."""
    n, h, w, c = x.shape
    xp = jnp.pad(x, ((0, 0), (pad, pad), (pad, pad), (0, 0)))
    ho = (h + 2 * pad - kh) // stride + 1
    wo = (w + 2 * pad - kw) // stride + 1
    cols = []
    for i in range(kh):
        for j in range(kw):
            cols.append(
                xp[:, i:i + (ho - 1) * stride + 1:stride,
                   j:j + (wo - 1) * stride + 1:stride, :]
            )
    patches = jnp.stack(cols, axis=3)  # (N, Ho, Wo, kh*kw, C)
    return patches.reshape(n * ho * wo, kh * kw * c), ho, wo


def conv_bn(x, cp, bnp, stride, pad, relu, residual=None):
    """Conv2d (no bias) + BatchNorm2d (batch stats) [+ residual] [+ ReLU]. NHWC bf16.

    Channel widths below 128 are physically zero-padded to 128 (lane-dense blocks);
    the padded channels stay exactly zero through BN/ReLU and are consumed by zero
    weight rows in the next layer.
    """
    n = x.shape[0]
    kh, kw, cout = cp["kh"], cp["kw"], cp["cout_phys"]
    if kh == 1 and kw == 1:
        xs = x[:, ::stride, ::stride, :] if stride > 1 else x
        ho, wo = xs.shape[1], xs.shape[2]
        a = xs.reshape(n * ho * wo, xs.shape[3])
    else:
        a, ho, wo = _im2col(x, kh, kw, stride, pad)
    m_true, k_true = a.shape

    tm, m_pad = _tile_m(m_true)
    tk, k_pad = _tile_k(k_true)

    a = jnp.pad(a.astype(jnp.bfloat16),
                ((0, m_pad - m_true), (0, k_pad - k_true)))
    w = cp["w"]  # (k_pad, cout_phys) bf16, K padded consistently at build time
    assert w.shape == (k_pad, cout), (w.shape, k_pad, cout)

    y, psum, psq = _get_conv_matmul(m_pad, k_pad, cout, tm, tk)(a, w)

    # Finalize training-mode BatchNorm statistics (biased variance over N*Ho*Wo rows;
    # zero-padded rows contribute zero to both partial sums). Tiny (C,)-sized math.
    inv_cnt = 1.0 / float(m_true)
    mean = psum.sum(axis=0) * inv_cnt
    ex2 = psq.sum(axis=0) * inv_cnt
    var = jnp.maximum(ex2 - mean * mean, 0.0)  # clamp: guards f32 cancellation
    scale = bnp["gamma"] * jax.lax.rsqrt(var + _BN_EPS)
    shift = bnp["beta"] - mean * scale

    tm_epi = _tile_m_epilogue(m_pad, tm)
    args = [y, scale.reshape(1, cout), shift.reshape(1, cout)]
    if residual is not None:
        r = residual.reshape(m_true, cout).astype(jnp.bfloat16)
        args.append(jnp.pad(r, ((0, m_pad - m_true), (0, 0))))
    out = _get_bn_epilogue(m_pad, cout, tm_epi, relu, residual is not None)(*args)
    return out[:m_true].reshape(n, ho, wo, cout)


def maxpool_3x3_s2_p1(x):
    # Running jnp.maximum over the 9 shifted windows (XLA fuses; ~1/9 the HBM traffic
    # of materializing a (9, M, C) tensor).
    n, h, w, c = x.shape
    xp = jnp.pad(x, ((0, 0), (1, 1), (1, 1), (0, 0)), constant_values=-jnp.inf)
    ho = (h + 2 - 3) // 2 + 1
    wo = (w + 2 - 3) // 2 + 1
    out = None
    for i in range(3):
        for j in range(3):
            tap = xp[:, i:i + (ho - 1) * 2 + 1:2, j:j + (wo - 1) * 2 + 1:2, :]
            out = tap if out is None else jnp.maximum(out, tap)
    return out


# --------------------------------------------------------------------------- params


def make_resnet152_params(num_classes, key):
    """Deterministic synthetic parameters with torchvision ResNet-152 shapes.

    Channel counts below 128 (the 64-wide stem / layer1 widths) get 128 physical
    channels: extra weight rows/columns are zero, so results are unchanged while
    every Pallas output block is >= 128 lanes wide.
    """
    idx = [0]

    def nkey():
        k = jax.random.fold_in(key, idx[0])
        idx[0] += 1
        return k

    def phys(c):
        return c if c >= 128 else 128

    def conv(cout, cin, kh, kw, cin_phys=None):
        cin_phys = cin if cin_phys is None else cin_phys
        cout_phys = phys(cout)
        fan_in = cin * kh * kw
        w = jax.random.normal(nkey(), (cout, cin, kh, kw), jnp.float32) * (2.0 / fan_in) ** 0.5
        # Zero-pad dead physical input/output channels.
        w = jnp.pad(w, ((0, cout_phys - cout), (0, cin_phys - cin), (0, 0), (0, 0)))
        # (Cout, Cin, KH, KW) -> (KH*KW*Cin, Cout), matching im2col (kh, kw, c) order.
        w_mat = jnp.transpose(w, (2, 3, 1, 0)).reshape(kh * kw * cin_phys, cout_phys)
        _, k_pad = _tile_k(kh * kw * cin_phys)
        w_mat = jnp.pad(w_mat, ((0, k_pad - kh * kw * cin_phys), (0, 0)))
        return {"w": w_mat.astype(jnp.bfloat16), "kh": kh, "kw": kw,
                "cout": cout, "cout_phys": cout_phys}

    def bn(c_phys):
        return {"gamma": jnp.ones((c_phys,), jnp.float32),
                "beta": jnp.zeros((c_phys,), jnp.float32)}

    params = {"conv1": conv(64, 3, 7, 7), "bn1": bn(phys(64))}
    layers_cfg = [(64, 3, 1), (128, 8, 2), (256, 36, 2), (512, 3, 2)]  # ResNet-152
    inplanes, inplanes_phys = 64, phys(64)
    layers = []
    for planes, blocks, stride in layers_cfg:
        blks = []
        p_phys = phys(planes)
        for bi in range(blocks):
            s = stride if bi == 0 else 1
            blk = {
                "stride": s,
                "conv1": conv(planes, inplanes, 1, 1, cin_phys=inplanes_phys),
                "bn1": bn(p_phys),
                "conv2": conv(planes, planes, 3, 3, cin_phys=p_phys),
                "bn2": bn(p_phys),
                "conv3": conv(planes * 4, planes, 1, 1, cin_phys=p_phys),
                "bn3": bn(phys(planes * 4)),
            }
            if s != 1 or inplanes != planes * 4:
                blk["ds_conv"] = conv(planes * 4, inplanes, 1, 1, cin_phys=inplanes_phys)
                blk["ds_bn"] = bn(phys(planes * 4))
            blks.append(blk)
            inplanes, inplanes_phys = planes * 4, phys(planes * 4)
        layers.append(blks)
    params["layers"] = layers
    fan_in = 512 * 4
    params["fc_w"] = jax.random.normal(nkey(), (fan_in, num_classes), jnp.float32) * (
        1.0 / fan_in) ** 0.5
    params["fc_b"] = jnp.zeros((1, num_classes), jnp.float32)
    return params


# -------------------------------------------------------------------------- forward


def bottleneck(x, blk):
    s = blk["stride"]
    out = conv_bn(x, blk["conv1"], blk["bn1"], 1, 0, True)
    out = conv_bn(out, blk["conv2"], blk["bn2"], s, 1, True)
    if "ds_conv" in blk:
        identity = conv_bn(x, blk["ds_conv"], blk["ds_bn"], s, 0, False)
    else:
        identity = x
    # conv3 + bn3, then residual add, then ReLU (residual/ReLU fused in the epilogue).
    return conv_bn(out, blk["conv3"], blk["bn3"], 1, 0, True, residual=identity)


def resnet152_forward(x_nchw, params):
    x = jnp.transpose(x_nchw, (0, 2, 3, 1)).astype(jnp.bfloat16)  # NCHW -> NHWC, bf16
    x = conv_bn(x, params["conv1"], params["bn1"], 2, 3, True)
    x = maxpool_3x3_s2_p1(x)
    for layer in params["layers"]:
        for blk in layer:
            x = bottleneck(x, blk)
    n, h, w, c = x.shape
    pooled = _get_avgpool(n, h * w, c)(x.reshape(n, h * w, c))
    num_classes = params["fc_w"].shape[1]
    return _get_fc(n, c, num_classes)(pooled, params["fc_w"], params["fc_b"])


# ------------------------------------------------------------------------------ main


if __name__ == "__main__":
    key = jax.random.PRNGKey(0)
    params = make_resnet152_params(num_classes=10, key=key)
    # Small input consistent with the module: NCHW, 3 input channels (ResNet stem).
    x = jax.random.normal(jax.random.fold_in(key, 123456), (2, 3, 32, 32), jnp.float32)
    logits = resnet152_forward(x, params)
    logits = jax.block_until_ready(logits)
    assert logits.shape == (2, 10), logits.shape
    assert bool(jnp.all(jnp.isfinite(logits)))
    print("KERNEL_OK")
</pallas_src>

<mosaic_0001>
module attributes {stable_mosaic.version = 11 : i64} {
  func.func @kernel(%arg0: i32, %arg1: memref<512x256xbf16, #tpu.memory_space<vmem>>, %arg2: memref<256x128xbf16, #tpu.memory_space<vmem>>, %arg3: memref<512x128xbf16, #tpu.memory_space<vmem>>, %arg4: memref<8x128xf32, #tpu.memory_space<vmem>>, %arg5: memref<8x128xf32, #tpu.memory_space<vmem>>) attributes {dimension_semantics = [#tpu.dimension_semantics<parallel>], iteration_bounds = array<i64: 1>, scalar_prefetch = 0 : i64, scratch_operands = 0 : i64, tpu.core_type = #tpu.core_type<tc>, window_params = [{transform_indices = @transform_0, window_bounds = array<i64: 512, 256>}, {pipeline_mode = #tpu.pipeline_mode<synchronous>, transform_indices = @transform_1, window_bounds = array<i64: 256, 128>}, {transform_indices = @transform_2, window_bounds = array<i64: 512, 128>}, {transform_indices = @transform_3, window_bounds = array<i64: 8, 128>}, {transform_indices = @transform_4, window_bounds = array<i64: 8, 128>}]} {
    %c0 = arith.constant 0 : index
    %c0_0 = arith.constant 0 : index
    %0 = vector.load %arg1[%c0, %c0_0] : memref<512x256xbf16, #tpu.memory_space<vmem>>, vector<512x256xbf16>
    %c0_1 = arith.constant 0 : index
    %c0_2 = arith.constant 0 : index
    %1 = vector.load %arg2[%c0_1, %c0_2] : memref<256x128xbf16, #tpu.memory_space<vmem>>, vector<256x128xbf16>
    %cst = arith.constant dense<0.000000e+00> : vector<512x128xf32>
    %2 = tpu.matmul %0, %1, %cst {dimension_numbers = #tpu.dot_dimension_numbers<[1], [0], [0], [1], [0, 0, 1, 1], [], []>} : vector<512x256xbf16>, vector<256x128xbf16>, vector<512x128xf32> -> vector<512x128xf32>
    %3 = arith.truncf %2 : vector<512x128xf32> to vector<512x128xbf16>
    %c0_3 = arith.constant 0 : index
    %c0_4 = arith.constant 0 : index
    %4 = vector.load %arg3[%c0_3, %c0_4] : memref<512x128xbf16, #tpu.memory_space<vmem>>, vector<512x128xbf16>
    tpu.vector_store %arg3[%c0_3, %c0_4], %3 {strides = array<i32>} : memref<512x128xbf16, #tpu.memory_space<vmem>>, vector<512x128xbf16>,
    %5 = vector.shape_cast %2 : vector<512x128xf32> to vector<64x8x128xf32>
    %cst_5 = arith.constant dense<0.000000e+00> : vector<8x128xf32>
    %6 = vector.multi_reduction <add>, %5, %cst_5 [0] : vector<64x8x128xf32> to vector<8x128xf32>
    %c0_6 = arith.constant 0 : index
    %c0_7 = arith.constant 0 : index
    %7 = vector.load %arg4[%c0_6, %c0_7] : memref<8x128xf32, #tpu.memory_space<vmem>>, vector<8x128xf32>
    tpu.vector_store %arg4[%c0_6, %c0_7], %6 {strides = array<i32>} : memref<8x128xf32, #tpu.memory_space<vmem>>, vector<8x128xf32>,
    %8 = arith.mulf %5, %5 : vector<64x8x128xf32>
    %cst_8 = arith.constant dense<0.000000e+00> : vector<8x128xf32>
    %9 = vector.multi_reduction <add>, %8, %cst_8 [0] : vector<64x8x128xf32> to vector<8x128xf32>
    %c0_9 = arith.constant 0 : index
    %c0_10 = arith.constant 0 : index
    %10 = vector.load %arg5[%c0_9, %c0_10] : memref<8x128xf32, #tpu.memory_space<vmem>>, vector<8x128xf32>
    tpu.vector_store %arg5[%c0_9, %c0_10], %9 {strides = array<i32>} : memref<8x128xf32, #tpu.memory_space<vmem>>, vector<8x128xf32>,
    return
  }
  func.func @transform_0(%arg0: i32) -> (i32, i32) {
    %c0_i32 = arith.constant 0 : i32
    %c0_i32_0 = arith.constant 0 : i32
    return %arg0, %c0_i32 : i32, i32
  }
  func.func @transform_1(%arg0: i32) -> (i32, i32) {
    %c0_i32 = arith.constant 0 : i32
    %c0_i32_0 = arith.constant 0 : i32
    %c0_i32_1 = arith.constant 0 : i32
    return %c0_i32, %c0_i32_0 : i32, i32
  }
  func.func @transform_2(%arg0: i32) -> (i32, i32) {
    %c0_i32 = arith.constant 0 : i32
    %c0_i32_0 = arith.constant 0 : i32
    return %arg0, %c0_i32 : i32, i32
  }
  func.func @transform_3(%arg0: i32) -> (i32, i32) {
    %c0_i32 = arith.constant 0 : i32
    %c0_i32_0 = arith.constant 0 : i32
    return %arg0, %c0_i32 : i32, i32
  }
  func.func @transform_4(%arg0: i32) -> (i32, i32) {
    %c0_i32 = arith.constant 0 : i32
    %c0_i32_0 = arith.constant 0 : i32
    return %arg0, %c0_i32 : i32, i32
  }
}

</mosaic_0001>

<bundles_post_ra>
// kernel: tpu_custom_call.1
= control target key start
LH: loop header
LB: loop body
LE: loop exit
PB: predicated region body
PF: predicated region fallthrough
CT: control target
= control target key end

     0   :  { %10 = vsyncpa [#allocation3], 0  ;;  %s2399_s0 = inlined_call_operand.hbm [shape: bf16[512,256], index: 0, kind: input, shape index: {}]   ;;  %s2400_s1 = inlined_call_operand.hbm [shape: bf16[256,128], index: 1, kind: input, shape index: {}]   ;;  %s2401_s2 = inlined_call_operand.hbm [shape: bf16[512,128], index: 2, kind: output, shape index: {0}]   ;;  %s2402_s3 = inlined_call_operand.hbm [shape: f32[8,128], index: 3, kind: output, shape index: {1}]   ;;  %s2403_s4 = inlined_call_operand.hbm [shape: f32[8,128], index: 4, kind: output, shape index: {2}]  }
   0x1   :  { %11 = vsyncpa [#allocation6], 0 }
   0x2   :  { %12 = vsyncpa [#allocation4], 0 }
   0x3   :  { %13 = vsyncpa [#allocation9], 0  ;;  %s2074_s15 = smov [#allocation2]   ;;  %s1956_s19 = scalar_lea.hbm %s2399_s0, 8192 }
   0x4   :  { %s19_s16 = sshll.u32 %s2074_s15, 4  ;;  %p1957_p0 = scmp.ne.s32.totalorder %s2399_s0, %s1956_s19  ;;  %s20_s16 = int_to_ptr.vmem [resolvable:$true] %s19_s16 }
   0x5   :  { %p1960_p1 = scmp.lt.u32.totalorder %s1956_s19, %s2399_s0 }
   0x7   :  { %p1962_p2 = pnand %p1960_p1, %p1957_p0 }
   0x9   :  { %1965 = shalt.err (!%p1962_p2)
}
   0xa   :  { %s1966_s24 = scalar_lea.vmem %s20_s16, 8192  ;;  %p1971_p4 = scmp.lt.s32.totalorder %s20_s16, %s20_s16 }
   0xb   :  { %p1967_p3 = scmp.ne.s32.totalorder %s20_s16, %s1966_s24  ;;  %p1972_p5 = scmp.lt.s32.totalorder %s1966_s24, %s1966_s24 }
   0xd   :  { %p1973_p6 = por %p1972_p5, %p1971_p4 }
   0xf   :  { %p1974_p7 = pnand %p1973_p6, %p1967_p3 }
  0x11   :  { %1977 = shalt.err (!%p1974_p7)
}
  0x12   :  { %s2075_s25 = smov 128   ;;  %s2076_s26 = smov 8  }
  0x13   :  { %25 = dma.hbm_to_vmem [thread:$0]  %s2399_s0, 8192, %s20_s16, [#allocation3], %s2075_s25, %s2075_s25, %s2076_s26  }
  0x14   :  { %s2077_s29 = smov [#allocation5]   ;;  %s1978_s7 = scalar_lea.hbm %s2400_s1, 2048 }
  0x15   :  { %s31_s30 = sshll.u32 %s2077_s29, 4  ;;  %p1979_p8 = scmp.ne.s32.totalorder %s2400_s1, %s1978_s7  ;;  %s32_s30 = int_to_ptr.vmem [resolvable:$true] %s31_s30 }
  0x16   :  { %p1982_p9 = scmp.lt.u32.totalorder %s1978_s7, %s2400_s1 }
  0x18   :  { %p1984_p10 = pnand %p1982_p9, %p1979_p8 }
  0x1a   :  { %1987 = shalt.err (!%p1984_p10)
}
  0x1b   :  { %s1988_s12 = scalar_lea.vmem %s32_s30, 2048  ;;  %p1993_p12 = scmp.lt.s32.totalorder %s32_s30, %s32_s30 }
  0x1c   :  { %p1989_p11 = scmp.ne.s32.totalorder %s32_s30, %s1988_s12  ;;  %p1994_p13 = scmp.lt.s32.totalorder %s1988_s12, %s1988_s12 }
  0x1e   :  { %p1995_p0 = por %p1994_p13, %p1993_p12 }
  0x20   :  { %p1996_p1 = pnand %p1995_p0, %p1989_p11 }
  0x22   :  { %1999 = shalt.err (!%p1996_p1)
}
  0x23   :  { %s2078_s0 = smov 64   ;;  %s2079_s13 = smov 4  }
  0x24   :  { %37 = dma.hbm_to_vmem [thread:$0]  %s2400_s1, 2048, %s32_s30, [#allocation6], %s2078_s0, %s2078_s0, %s2079_s13  }
  0x25   :  { %2066 = dma.done.wait [#allocation3], 8192  }
  0x26   :  { %2067 = vsyncadd [#allocation3], 4294959104 }
  0x27   :  { %2068 = dma.done.wait [#allocation6], 2048  }
  0x28   :  { %2069 = vsyncadd [#allocation6], 4294965248  ;;  %v2080_v0 = vmov 0   ;;  %v1844_v1 = vld [vmem:[#allocation5] sm:$0xff]   ;;  %v1845_v2 = vld [vmem:[#allocation5 + $0x8] sm:$0xff]   ;;  %s2081_s1 = smov [#allocation7]  }
  0x29   :  { %557 = vmatprep.subr.bf16.mxu0 %v2080_v0  ;;  %1802 = vmatprep.subr.bf16.mxu1 %v2080_v0  ;;  %v1846_v3 = vld [vmem:[#allocation5 + $0x10] sm:$0xff]   ;;  %v1847_v4 = vld [vmem:[#allocation5 + $0x18] sm:$0xff]   ;;  %v1848_v5 = vld [vmem:[#allocation5 + $0x20] sm:$0xff]   ;;  %s1363_s16 = sshll.u32 %s2081_s1, 4  ;;  %s1364_s16 = int_to_ptr.vmem [resolvable:$true] %s1363_s16 }
  0x2a   :  { %558 = vmatpush1.bf16.msra.mxu0 %v1844_v1  ;;  %1818 = vmatpush1.bf16.msra.mxu1 %v1844_v1  ;;  %v1862_v6 = vld [vmem:[#allocation2 + $0x4] ss:$8 sps:$4 sm:$0xff]   ;;  %v1850_v8 = vld [vmem:[#allocation5 + $0x30] sm:$0xff]   ;;  %v1851_v9 = vld [vmem:[#allocation5 + $0x38] sm:$0xff]   ;;  %s2000_s17 = scalar_lea.vmem %s1364_s16, 4096  ;;  %p2005_p3 = scmp.lt.s32.totalorder %s1364_s16, %s1364_s16 }
  0x2b   :  { %559 = vmatprep.subr.bf16.mxu0 %v2080_v0  ;;  %1803 = vmatprep.subr.bf16.mxu1 %v2080_v0  ;;  %v1849_v7 = vld [vmem:[#allocation5 + $0x28] sm:$0xff]   ;;  %v1852_v11 = vld [vmem:[#allocation5 + $0x40] sm:$0xff]   ;;  %v1854_v13 = vld [vmem:[#allocation5 + $0x50] sm:$0xff]   ;;  %p2001_p2 = scmp.ne.s32.totalorder %s1364_s16, %s2000_s17  ;;  %p2006_p4 = scmp.lt.s32.totalorder %s2000_s17, %s2000_s17 }
  0x2c   :  { %589 = vmatprep.mubr.bf16.mxu0 %v1862_v6  ;;  %v1886_v10 = vld [vmem:[#allocation2 + $0x104] ss:$8 sps:$4 sm:$0xff]   ;;  %v1855_v14 = vld [vmem:[#allocation5 + $0x58] sm:$0xff]   ;;  %v1858_v17 = vld [vmem:[#allocation5 + $0x70] sm:$0xff]  }
  0x2d   :  { %717 = vmatprep.mubr.bf16.mxu1 %v1886_v10  ;;  %v1853_v12 = vld [vmem:[#allocation5 + $0x48] sm:$0xff]   ;;  %v1856_v15 = vld [vmem:[#allocation5 + $0x60] sm:$0xff]   ;;  %v1859_v18 = vld [vmem:[#allocation5 + $0x78] sm:$0xff]   ;;  %p2007_p5 = por %p2006_p4, %p2005_p3 }
  0x2e   :  { %560 = vmatpush1.bf16.msra.mxu0 %v1845_v2  ;;  %1819 = vmatpush1.bf16.msra.mxu1 %v1845_v2  ;;  %v1857_v16 = vld [vmem:[#allocation5 + $0x68] sm:$0xff]   ;;  %v1863_v21 = vld [vmem:[#allocation2 + $0x14] ss:$8 sps:$4 sm:$0xff]   ;;  %v1865_v23 = vld [vmem:[#allocation2 + $0x10] ss:$8 sps:$4 sm:$0xff]  }
  0x2f   :  { %561 = vmatprep.subr.bf16.mxu0 %v2080_v0  ;;  %1804 = vmatprep.subr.bf16.mxu1 %v2080_v0  ;;  %v1860_v19 = vld [vmem:[#allocation2] ss:$8 sps:$4 sm:$0xff]   ;;  %v1890_v22 = vld [vmem:[#allocation2 + $0x114] ss:$8 sps:$4 sm:$0xff]   ;;  %v1892_v24 = vld [vmem:[#allocation2 + $0x110] ss:$8 sps:$4 sm:$0xff]   ;;  %p2008_p6 = pnand %p2007_p5, %p2001_p2 }
  0x30   :  { %v1884_v20 = vld [vmem:[#allocation2 + $0x100] ss:$8 sps:$4 sm:$0xff]   ;;  %v1866_v25 = vld [vmem:[#allocation2 + $0x24] ss:$8 sps:$4 sm:$0xff]   ;;  %v1869_v29 = vld [vmem:[#allocation2 + $0x34] ss:$8 sps:$4 sm:$0xff]  }
  0x31   :  { %v1896_v26 = vld [vmem:[#allocation2 + $0x124] ss:$8 sps:$4 sm:$0xff]   ;;  %v1868_v27 = vld [vmem:[#allocation2 + $0x20] ss:$8 sps:$4 sm:$0xff]   ;;  %v1902_v30 = vld [vmem:[#allocation2 + $0x134] ss:$8 sps:$4 sm:$0xff]  }
  0x32   :  { %562 = vmatpush1.bf16.msra.mxu0 %v1846_v3  ;;  %1820 = vmatpush1.bf16.msra.mxu1 %v1846_v3  ;;  %v1898_v28 = vld [vmem:[#allocation2 + $0x120] ss:$8 sps:$4 sm:$0xff]   ;;  %v1871_v31 = vld [vmem:[#allocation2 + $0x30] ss:$8 sps:$4 sm:$0xff]   ;;  %v1872_v33 = vld [vmem:[#allocation2 + $0x44] ss:$8 sps:$4 sm:$0xff]  }
  0x33   :  { %563 = vmatprep.subr.bf16.mxu0 %v2080_v0  ;;  %1805 = vmatprep.subr.bf16.mxu1 %v2080_v0  ;;  %v1904_v32 = vld [vmem:[#allocation2 + $0x130] ss:$8 sps:$4 sm:$0xff]   ;;  %v1908_v34 = vld [vmem:[#allocation2 + $0x144] ss:$8 sps:$4 sm:$0xff]   ;;  %v1874_v35 = vld [vmem:[#allocation2 + $0x40] ss:$8 sps:$4 sm:$0xff]  }
  0x34   :  { %v1910_v36 = vld [vmem:[#allocation2 + $0x140] ss:$8 sps:$4 sm:$0xff]   ;;  %v1875_v37 = vld [vmem:[#allocation2 + $0x54] ss:$8 sps:$4 sm:$0xff]   ;;  %v1877_v39 = vld [vmem:[#allocation2 + $0x50] ss:$8 sps:$4 sm:$0xff]  }
  0x35   :  { %v1914_v38 = vld [vmem:[#allocation2 + $0x154] ss:$8 sps:$4 sm:$0xff]   ;;  %v1916_v40 = vld [vmem:[#allocation2 + $0x150] ss:$8 sps:$4 sm:$0xff]   ;;  %v1878_v41 = vld [vmem:[#allocation2 + $0x64] ss:$8 sps:$4 sm:$0xff]  }
  0x36   :  { %564 = vmatpush1.bf16.msra.mxu0 %v1847_v4  ;;  %1821 = vmatpush1.bf16.msra.mxu1 %v1847_v4  ;;  %v1920_v42 = vld [vmem:[#allocation2 + $0x164] ss:$8 sps:$4 sm:$0xff]   ;;  %v1880_v43 = vld [vmem:[#allocation2 + $0x60] ss:$8 sps:$4 sm:$0xff]   ;;  %v1881_v45 = vld [vmem:[#allocation2 + $0x74] ss:$8 sps:$4 sm:$0xff]  }
  0x37   :  { %565 = vmatprep.subr.bf16.mxu0 %v2080_v0  ;;  %1806 = vmatprep.subr.bf16.mxu1 %v2080_v0  ;;  %v1922_v44 = vld [vmem:[#allocation2 + $0x160] ss:$8 sps:$4 sm:$0xff]   ;;  %v1926_v46 = vld [vmem:[#allocation2 + $0x174] ss:$8 sps:$4 sm:$0xff]   ;;  %v1883_v47 = vld [vmem:[#allocation2 + $0x70] ss:$8 sps:$4 sm:$0xff]  }
  0x38   :  { %v1928_v48 = vld [vmem:[#allocation2 + $0x170] ss:$8 sps:$4 sm:$0xff]   ;;  %v1887_v49 = vld [vmem:[#allocation2 + $0x84] ss:$8 sps:$4 sm:$0xff]   ;;  %v1889_v51 = vld [vmem:[#allocation2 + $0x80] ss:$8 sps:$4 sm:$0xff]  }
  0x39   :  { %v1932_v50 = vld [vmem:[#allocation2 + $0x184] ss:$8 sps:$4 sm:$0xff]   ;;  %v1934_v52 = vld [vmem:[#allocation2 + $0x180] ss:$8 sps:$4 sm:$0xff]   ;;  %v1893_v53 = vld [vmem:[#allocation2 + $0x94] ss:$8 sps:$4 sm:$0xff]  }
  0x3a   :  { %566 = vmatpush1.bf16.msra.mxu0 %v1848_v5  ;;  %1822 = vmatpush1.bf16.msra.mxu1 %v1848_v5  ;;  %v1935_v54 = vld [vmem:[#allocation2 + $0x194] ss:$8 sps:$4 sm:$0xff]   ;;  %v1895_v55 = vld [vmem:[#allocation2 + $0x90] ss:$8 sps:$4 sm:$0xff]   ;;  %v1899_v57 = vld [vmem:[#allocation2 + $0xa4] ss:$8 sps:$4 sm:$0xff]  }
  0x3b   :  { %567 = vmatprep.subr.bf16.mxu0 %v2080_v0  ;;  %1807 = vmatprep.subr.bf16.mxu1 %v2080_v0  ;;  %v1937_v56 = vld [vmem:[#allocation2 + $0x190] ss:$8 sps:$4 sm:$0xff]   ;;  %v1938_v58 = vld [vmem:[#allocation2 + $0x1a4] ss:$8 sps:$4 sm:$0xff]   ;;  %v1901_v59 = vld [vmem:[#allocation2 + $0xa0] ss:$8 sps:$4 sm:$0xff]  }
  0x3c   :  { %v1940_v60 = vld [vmem:[#allocation2 + $0x1a0] ss:$8 sps:$4 sm:$0xff]   ;;  %v1905_v61 = vld [vmem:[#allocation2 + $0xb4] ss:$8 sps:$4 sm:$0xff]   ;;  %v1907_v63 = vld [vmem:[#allocation2 + $0xb0] ss:$8 sps:$4 sm:$0xff]  }
  0x3d   :  { %v1941_v62 = vld [vmem:[#allocation2 + $0x1b4] ss:$8 sps:$4 sm:$0xff]   ;;  %v1911_v1 = vld [vmem:[#allocation2 + $0xc4] ss:$8 sps:$4 sm:$0xff]   ;;  %v1913_v3 = vld [vmem:[#allocation2 + $0xc0] ss:$8 sps:$4 sm:$0xff]  }
  0x3e   :  { %568 = vmatpush1.bf16.msra.mxu0 %v1849_v7  ;;  %1823 = vmatpush1.bf16.msra.mxu1 %v1849_v7  ;;  %v1944_v2 = vld [vmem:[#allocation2 + $0x1c4] ss:$8 sps:$4 sm:$0xff]   ;;  %v1946_v4 = vld [vmem:[#allocation2 + $0x1c0] ss:$8 sps:$4 sm:$0xff]   ;;  %v1917_v5 = vld [vmem:[#allocation2 + $0xd4] ss:$8 sps:$4 sm:$0xff]  }
  0x3f   :  { %569 = vmatprep.subr.bf16.mxu0 %v2080_v0  ;;  %1808 = vmatprep.subr.bf16.mxu1 %v2080_v0  ;;  %v1947_v6 = vld [vmem:[#allocation2 + $0x1d4] ss:$8 sps:$4 sm:$0xff]   ;;  %v1919_v7 = vld [vmem:[#allocation2 + $0xd0] ss:$8 sps:$4 sm:$0xff]   ;;  %v1950_v10 = vld [vmem:[#allocation2 + $0x1e4] ss:$8 sps:$4 sm:$0xff]  }
  0x42   :  { %570 = vmatpush1.bf16.msra.mxu0 %v1850_v8  ;;  %1824 = vmatpush1.bf16.msra.mxu1 %v1850_v8  ;;  %v1949_v8 = vld [vmem:[#allocation2 + $0x1d0] ss:$8 sps:$4 sm:$0xff]  }
  0x43   :  { %571 = vmatprep.subr.bf16.mxu0 %v2080_v0  ;;  %1809 = vmatprep.subr.bf16.mxu1 %v2080_v0 }
  0x46   :  { %572 = vmatpush1.bf16.msra.mxu0 %v1851_v9  ;;  %1825 = vmatpush1.bf16.msra.mxu1 %v1851_v9  ;;  %v1923_v9 = vld [vmem:[#allocation2 + $0xe4] ss:$8 sps:$4 sm:$0xff]  }
  0x47   :  { %573 = vmatprep.subr.bf16.mxu0 %v2080_v0  ;;  %1810 = vmatprep.subr.bf16.mxu1 %v2080_v0 }
  0x4a   :  { %574 = vmatpush1.bf16.msra.mxu0 %v1852_v11  ;;  %1826 = vmatpush1.bf16.msra.mxu1 %v1852_v11  ;;  %v1925_v11 = vld [vmem:[#allocation2 + $0xe0] ss:$8 sps:$4 sm:$0xff]  }
  0x4b   :  { %575 = vmatprep.subr.bf16.mxu0 %v2080_v0  ;;  %1811 = vmatprep.subr.bf16.mxu1 %v2080_v0 }
  0x4e   :  { %576 = vmatpush1.bf16.msra.mxu0 %v1853_v12  ;;  %1827 = vmatpush1.bf16.msra.mxu1 %v1853_v12  ;;  %v1952_v12 = vld [vmem:[#allocation2 + $0x1e0] ss:$8 sps:$4 sm:$0xff]  }
  0x4f   :  { %577 = vmatprep.subr.bf16.mxu0 %v2080_v0  ;;  %1812 = vmatprep.subr.bf16.mxu1 %v2080_v0 }
  0x52   :  { %578 = vmatpush1.bf16.msra.mxu0 %v1854_v13  ;;  %1828 = vmatpush1.bf16.msra.mxu1 %v1854_v13  ;;  %v1929_v13 = vld [vmem:[#allocation2 + $0xf4] ss:$8 sps:$4 sm:$0xff]  }
  0x53   :  { %579 = vmatprep.subr.bf16.mxu0 %v2080_v0  ;;  %1813 = vmatprep.subr.bf16.mxu1 %v2080_v0 }
  0x56   :  { %580 = vmatpush1.bf16.msra.mxu0 %v1855_v14  ;;  %1829 = vmatpush1.bf16.msra.mxu1 %v1855_v14  ;;  %v1953_v14 = vld [vmem:[#allocation2 + $0x1f4] ss:$8 sps:$4 sm:$0xff]  }
  0x57   :  { %581 = vmatprep.subr.bf16.mxu0 %v2080_v0  ;;  %1814 = vmatprep.subr.bf16.mxu1 %v2080_v0 }
  0x5a   :  { %582 = vmatpush1.bf16.msra.mxu0 %v1856_v15  ;;  %1830 = vmatpush1.bf16.msra.mxu1 %v1856_v15  ;;  %v1931_v15 = vld [vmem:[#allocation2 + $0xf0] ss:$8 sps:$4 sm:$0xff]  }
  0x5b   :  { %583 = vmatprep.subr.bf16.mxu0 %v2080_v0  ;;  %1815 = vmatprep.subr.bf16.mxu1 %v2080_v0 }
  0x5e   :  { %584 = vmatpush1.bf16.msra.mxu0 %v1857_v16  ;;  %1831 = vmatpush1.bf16.msra.mxu1 %v1857_v16  ;;  %v1955_v16 = vld [vmem:[#allocation2 + $0x1f0] ss:$8 sps:$4 sm:$0xff]  }
  0x5f   :  { %585 = vmatprep.subr.bf16.mxu0 %v2080_v0  ;;  %1816 = vmatprep.subr.bf16.mxu1 %v2080_v0 }
  0x62   :  { %586 = vmatpush1.bf16.msra.mxu0 %v1858_v17  ;;  %1832 = vmatpush1.bf16.msra.mxu1 %v1858_v17 }
  0x63   :  { %587 = vmatprep.subr.bf16.mxu0 %v2080_v0  ;;  %1817 = vmatprep.subr.bf16.mxu1 %v2080_v0  ;;  %v1943_v0 = vld [vmem:[#allocation2 + $0x1b0] ss:$8 sps:$4 sm:$0xff]  }
  0x66   :  { %588 = vmatpush1.bf16.msra.mxu0 %v1859_v18  ;;  %1833 = vmatpush1.bf16.msra.mxu1 %v1859_v18 }
  0x69   :  { %590 = vmatmul.mubr.bf16.vlgmr.msra.gmra.mrb[0].mxu0 %v1860_v19  ;;  %718 = vmatmul.mubr.bf16.vlgmr.msra.gmra.mrb[0].mxu1 %v1884_v20 }
  0x6a   :  { %597 = vmatprep.mubr.bf16.mxu0 %v1863_v21  ;;  %725 = vmatprep.mubr.bf16.mxu1 %v1890_v22 }
  0x71   :  { %598 = vmatmul.mubr.bf16.gmra.mrb[4].mxu0 %v1865_v23  ;;  %726 = vmatmul.mubr.bf16.gmra.mrb[4].mxu1 %v1892_v24 }
  0x72   :  { %605 = vmatprep.mubr.bf16.mxu0 %v1866_v25  ;;  %733 = vmatprep.mubr.bf16.mxu1 %v1896_v26 }
  0x79   :  { %606 = vmatmul.mubr.bf16.gmra.mrb[8].mxu0 %v1868_v27  ;;  %734 = vmatmul.mubr.bf16.gmra.mrb[8].mxu1 %v1898_v28 }
  0x7a   :  { %613 = vmatprep.mubr.bf16.mxu0 %v1869_v29  ;;  %741 = vmatprep.mubr.bf16.mxu1 %v1902_v30 }
  0x81   :  { %614 = vmatmul.mubr.bf16.gmra.mrb[12].mxu0 %v1871_v31  ;;  %742 = vmatmul.mubr.bf16.gmra.mrb[12].mxu1 %v1904_v32 }
  0x82   :  { %621 = vmatprep.mubr.bf16.mxu0 %v1872_v33  ;;  %749 = vmatprep.mubr.bf16.mxu1 %v1908_v34 }
  0x89   :  { %622 = vmatmul.mubr.bf16.gmra.mrb[16].mxu0 %v1874_v35  ;;  %750 = vmatmul.mubr.bf16.gmra.mrb[16].mxu1 %v1910_v36 }
  0x8a   :  { %629 = vmatprep.mubr.bf16.mxu0 %v1875_v37  ;;  %757 = vmatprep.mubr.bf16.mxu1 %v1914_v38 }
  0x91   :  { %630 = vmatmul.mubr.bf16.gmra.mrb[20].mxu0 %v1877_v39  ;;  %758 = vmatmul.mubr.bf16.gmra.mrb[20].mxu1 %v1916_v40 }
  0x92   :  { %637 = vmatprep.mubr.bf16.mxu0 %v1878_v41  ;;  %765 = vmatprep.mubr.bf16.mxu1 %v1920_v42 }
  0x99   :  { %638 = vmatmul.mubr.bf16.gmra.mrb[24].mxu0 %v1880_v43  ;;  %766 = vmatmul.mubr.bf16.gmra.mrb[24].mxu1 %v1922_v44 }
  0x9a   :  { %645 = vmatprep.mubr.bf16.mxu0 %v1881_v45  ;;  %773 = vmatprep.mubr.bf16.mxu1 %v1926_v46 }
  0xa1   :  { %646 = vmatmul.mubr.bf16.gmra.mrb[28].mxu0 %v1883_v47  ;;  %774 = vmatmul.mubr.bf16.gmra.mrb[28].mxu1 %v1928_v48 }
  0xa2   :  { %653 = vmatprep.mubr.bf16.mxu0 %v1887_v49  ;;  %781 = vmatprep.mubr.bf16.mxu1 %v1932_v50 }
  0xa9   :  { %654 = vmatmul.mubr.bf16.gmra.mrb[32].mxu0 %v1889_v51  ;;  %782 = vmatmul.mubr.bf16.gmra.mrb[32].mxu1 %v1934_v52 }
  0xaa   :  { %661 = vmatprep.mubr.bf16.mxu0 %v1893_v53  ;;  %789 = vmatprep.mubr.bf16.mxu1 %v1935_v54 }
  0xb1   :  { %662 = vmatmul.mubr.bf16.gmra.mrb[36].mxu0 %v1895_v55  ;;  %790 = vmatmul.mubr.bf16.gmra.mrb[36].mxu1 %v1937_v56 }
  0xb2   :  { %669 = vmatprep.mubr.bf16.mxu0 %v1899_v57  ;;  %797 = vmatprep.mubr.bf16.mxu1 %v1938_v58 }
  0xb9   :  { %670 = vmatmul.mubr.bf16.gmra.mrb[40].mxu0 %v1901_v59  ;;  %798 = vmatmul.mubr.bf16.gmra.mrb[40].mxu1 %v1940_v60 }
  0xba   :  { %677 = vmatprep.mubr.bf16.mxu0 %v1905_v61  ;;  %805 = vmatprep.mubr.bf16.mxu1 %v1941_v62 }
  0xc1   :  { %678 = vmatmul.mubr.bf16.gmra.mrb[44].mxu0 %v1907_v63  ;;  %806 = vmatmul.mubr.bf16.gmra.mrb[44].mxu1 %v1943_v0 }
  0xc2   :  { %685 = vmatprep.mubr.bf16.mxu0 %v1911_v1  ;;  %813 = vmatprep.mubr.bf16.mxu1 %v1944_v2 }
  0xc9   :  { %686 = vmatmul.mubr.bf16.gmra.mrb[48].mxu0 %v1913_v3  ;;  %814 = vmatmul.mubr.bf16.gmra.mrb[48].mxu1 %v1946_v4 }
  0xca   :  { %693 = vmatprep.mubr.bf16.mxu0 %v1917_v5  ;;  %821 = vmatprep.mubr.bf16.mxu1 %v1947_v6 }
  0xd1   :  { %694 = vmatmul.mubr.bf16.gmra.mrb[52].mxu0 %v1919_v7  ;;  %822 = vmatmul.mubr.bf16.gmra.mrb[52].mxu1 %v1949_v8 }
  0xd2   :  { %701 = vmatprep.mubr.bf16.mxu0 %v1923_v9  ;;  %829 = vmatprep.mubr.bf16.mxu1 %v1950_v10 }
  0xd9   :  { %702 = vmatmul.mubr.bf16.gmra.mrb[56].mxu0 %v1925_v11  ;;  %830 = vmatmul.mubr.bf16.gmra.mrb[56].mxu1 %v1952_v12 }
  0xda   :  { %709 = vmatprep.mubr.bf16.mxu0 %v1929_v13  ;;  %837 = vmatprep.mubr.bf16.mxu1 %v1953_v14 }
  0xe1   :  { %710 = vmatmul.mubr.bf16.gmra.mrb[60].mxu0 %v1931_v15  ;;  %838 = vmatmul.mubr.bf16.gmra.mrb[60].mxu1 %v1955_v16 }
 0x13c   :  { %v591_v17 = vpop.f32.mrb[0].mxu0  ;;  %v2168_v18 = vpop.f32.mrb[0].mxu1 }
 0x13d   :  { %v593_v19 = vpop.f32.mrb[1].mxu0  ;;  %v721_v20 = vpop.f32.mrb[1].mxu1  ;;  %v1230_v21 = vmul.f32 %v591_v17, %v591_v17 }
 0x13e   :  { %v594_v22 = vpop.f32.mrb[2].mxu0  ;;  %v2170_v23 = vpop.f32.mrb[2].mxu1 }
 0x13f   :  { %v1614_v24 = vpack.c.bf16 %v594_v22, %v591_v17  ;;  %v1166_v25 = vadd.f32 %v594_v22, %v591_v17  ;;  %v1231_v26 = vmul.f32 %v594_v22, %v594_v22  ;;  %v596_v27 = vpop.f32.mrb[3].mxu0  ;;  %v1694_v28 = vpack.c.bf16 %v2170_v23, %v2168_v18  ;;  %v724_v29 = vpop.f32.mrb[3].mxu1 }
 0x141   :  { %1615 = vst [vmem:[#allocation7] sm:$0xff] %v1614_v24   ;;  %v1294_v30 = vadd.f32 %v1231_v26, %v1230_v21  ;;  %1786 = vst [vmem:[#allocation7 + $0x80] sm:$0xff] %v1694_v28  }
 0x144   :  { %v599_v31 = vpop.f32.mrb[4].mxu0  ;;  %v2174_v32 = vpop.f32.mrb[4].mxu1 }
 0x145   :  { %v1167_v33 = vadd.f32 %v1166_v25, %v599_v31  ;;  %v1232_v34 = vmul.f32 %v599_v31, %v599_v31  ;;  %v601_v35 = vpop.f32.mrb[5].mxu0  ;;  %v729_v36 = vpop.f32.mrb[5].mxu1 }
 0x146   :  { %v602_v37 = vpop.f32.mrb[6].mxu0  ;;  %v2176_v38 = vpop.f32.mrb[6].mxu1 }
 0x147   :  { %v1295_v39 = vadd.f32 %v1294_v30, %v1232_v34  ;;  %v1619_v40 = vpack.c.bf16 %v602_v37, %v599_v31  ;;  %v1168_v41 = vadd.f32 %v1167_v33, %v602_v37  ;;  %v1233_v42 = vmul.f32 %v602_v37, %v602_v37  ;;  %v604_v43 = vpop.f32.mrb[7].mxu0  ;;  %v732_v44 = vpop.f32.mrb[7].mxu1 }
 0x148   :  { %v1699_v45 = vpack.c.bf16 %v2176_v38, %v2174_v32 }
 0x149   :  { %1771 = vst [vmem:[#allocation7 + $0x8] sm:$0xff] %v1619_v40   ;;  %v1296_v46 = vadd.f32 %v1295_v39, %v1233_v42 }
 0x14a   :  { %1787 = vst [vmem:[#allocation7 + $0x88] sm:$0xff] %v1699_v45  }
 0x14c   :  { %v607_v47 = vpop.f32.mrb[8].mxu0  ;;  %v2180_v48 = vpop.f32.mrb[8].mxu1 }
 0x14d   :  { %v1169_v49 = vadd.f32 %v1168_v41, %v607_v47  ;;  %v1234_v50 = vmul.f32 %v607_v47, %v607_v47  ;;  %v609_v51 = vpop.f32.mrb[9].mxu0  ;;  %v737_v52 = vpop.f32.mrb[9].mxu1 }
 0x14e   :  { %v610_v53 = vpop.f32.mrb[10].mxu0  ;;  %v2182_v54 = vpop.f32.mrb[10].mxu1 }
 0x14f   :  { %v1297_v55 = vadd.f32 %v1296_v46, %v1234_v50  ;;  %v1624_v56 = vpack.c.bf16 %v610_v53, %v607_v47  ;;  %v1170_v57 = vadd.f32 %v1169_v49, %v610_v53  ;;  %v1235_v58 = vmul.f32 %v610_v53, %v610_v53  ;;  %v612_v59 = vpop.f32.mrb[11].mxu0  ;;  %v740_v60 = vpop.f32.mrb[11].mxu1 }
 0x150   :  { %v1704_v61 = vpack.c.bf16 %v2182_v54, %v2180_v48 }
 0x151   :  { %1772 = vst [vmem:[#allocation7 + $0x10] sm:$0xff] %v1624_v56   ;;  %v1298_v62 = vadd.f32 %v1297_v55, %v1235_v58 }
 0x152   :  { %1788 = vst [vmem:[#allocation7 + $0x90] sm:$0xff] %v1704_v61  }
 0x154   :  { %v615_v63 = vpop.f32.mrb[12].mxu0  ;;  %v2186_v0 = vpop.f32.mrb[12].mxu1 }
 0x155   :  { %v1171_v1 = vadd.f32 %v1170_v57, %v615_v63  ;;  %v1236_v2 = vmul.f32 %v615_v63, %v615_v63  ;;  %v617_v3 = vpop.f32.mrb[13].mxu0  ;;  %v745_v4 = vpop.f32.mrb[13].mxu1 }
 0x156   :  { %v618_v5 = vpop.f32.mrb[14].mxu0  ;;  %v2188_v6 = vpop.f32.mrb[14].mxu1 }
 0x157   :  { %v1299_v7 = vadd.f32 %v1298_v62, %v1236_v2  ;;  %v1629_v8 = vpack.c.bf16 %v618_v5, %v615_v63  ;;  %v1172_v9 = vadd.f32 %v1171_v1, %v618_v5  ;;  %v1237_v10 = vmul.f32 %v618_v5, %v618_v5  ;;  %v620_v11 = vpop.f32.mrb[15].mxu0  ;;  %v748_v12 = vpop.f32.mrb[15].mxu1 }
 0x158   :  { %v1709_v13 = vpack.c.bf16 %v2188_v6, %v2186_v0 }
 0x159   :  { %1773 = vst [vmem:[#allocation7 + $0x18] sm:$0xff] %v1629_v8   ;;  %v1300_v14 = vadd.f32 %v1299_v7, %v1237_v10 }
 0x15a   :  { %1789 = vst [vmem:[#allocation7 + $0x98] sm:$0xff] %v1709_v13  }
 0x15c   :  { %v623_v15 = vpop.f32.mrb[16].mxu0  ;;  %v2192_v16 = vpop.f32.mrb[16].mxu1 }
 0x15d   :  { %v1173_v17 = vadd.f32 %v1172_v9, %v623_v15  ;;  %v1238_v19 = vmul.f32 %v623_v15, %v623_v15  ;;  %v625_v20 = vpop.f32.mrb[17].mxu0  ;;  %v753_v21 = vpop.f32.mrb[17].mxu1 }
 0x15e   :  { %v626_v22 = vpop.f32.mrb[18].mxu0  ;;  %v2194_v24 = vpop.f32.mrb[18].mxu1 }
 0x15f   :  { %v1301_v25 = vadd.f32 %v1300_v14, %v1238_v19  ;;  %v1634_v26 = vpack.c.bf16 %v626_v22, %v623_v15  ;;  %v1174_v27 = vadd.f32 %v1173_v17, %v626_v22  ;;  %v1239_v28 = vmul.f32 %v626_v22, %v626_v22  ;;  %v628_v29 = vpop.f32.mrb[19].mxu0  ;;  %v756_v30 = vpop.f32.mrb[19].mxu1 }
 0x160   :  { %v1714_v31 = vpack.c.bf16 %v2194_v24, %v2192_v16 }
 0x161   :  { %1774 = vst [vmem:[#allocation7 + $0x20] sm:$0xff] %v1634_v26   ;;  %v1302_v33 = vadd.f32 %v1301_v25, %v1239_v28 }
 0x162   :  { %1790 = vst [vmem:[#allocation7 + $0xa0] sm:$0xff] %v1714_v31  }
 0x164   :  { %v631_v34 = vpop.f32.mrb[20].mxu0  ;;  %v2198_v35 = vpop.f32.mrb[20].mxu1 }
 0x165   :  { %v1175_v36 = vadd.f32 %v1174_v27, %v631_v34  ;;  %v1240_v37 = vmul.f32 %v631_v34, %v631_v34  ;;  %v633_v39 = vpop.f32.mrb[21].mxu0  ;;  %v761_v40 = vpop.f32.mrb[21].mxu1 }
 0x166   :  { %v634_v41 = vpop.f32.mrb[22].mxu0  ;;  %v2200_v42 = vpop.f32.mrb[22].mxu1 }
 0x167   :  { %v1303_v43 = vadd.f32 %v1302_v33, %v1240_v37  ;;  %v1639_v44 = vpack.c.bf16 %v634_v41, %v631_v34  ;;  %v1176_v45 = vadd.f32 %v1175_v36, %v634_v41  ;;  %v1241_v46 = vmul.f32 %v634_v41, %v634_v41  ;;  %v636_v47 = vpop.f32.mrb[23].mxu0  ;;  %v764_v49 = vpop.f32.mrb[23].mxu1 }
 0x168   :  { %v1719_v50 = vpack.c.bf16 %v2200_v42, %v2198_v35 }
 0x169   :  { %1775 = vst [vmem:[#allocation7 + $0x28] sm:$0xff] %v1639_v44   ;;  %v1304_v51 = vadd.f32 %v1303_v43, %v1241_v46 }
 0x16a   :  { %1791 = vst [vmem:[#allocation7 + $0xa8] sm:$0xff] %v1719_v50  }
 0x16c   :  { %v639_v52 = vpop.f32.mrb[24].mxu0  ;;  %v2204_v53 = vpop.f32.mrb[24].mxu1 }
 0x16d   :  { %v1177_v55 = vadd.f32 %v1176_v45, %v639_v52  ;;  %v1242_v56 = vmul.f32 %v639_v52, %v639_v52  ;;  %v641_v57 = vpop.f32.mrb[25].mxu0  ;;  %v769_v58 = vpop.f32.mrb[25].mxu1 }
 0x16e   :  { %v642_v59 = vpop.f32.mrb[26].mxu0  ;;  %v2206_v60 = vpop.f32.mrb[26].mxu1 }
 0x16f   :  { %v1305_v61 = vadd.f32 %v1304_v51, %v1242_v56  ;;  %v1644_v62 = vpack.c.bf16 %v642_v59, %v639_v52  ;;  %v1178_v63 = vadd.f32 %v1177_v55, %v642_v59  ;;  %v1243_v1 = vmul.f32 %v642_v59, %v642_v59  ;;  %v644_v2 = vpop.f32.mrb[27].mxu0  ;;  %v772_v3 = vpop.f32.mrb[27].mxu1 }
 0x170   :  { %v1724_v4 = vpack.c.bf16 %v2206_v60, %v2204_v53 }
 0x171   :  { %1776 = vst [vmem:[#allocation7 + $0x30] sm:$0xff] %v1644_v62   ;;  %v1306_v5 = vadd.f32 %v1305_v61, %v1243_v1 }
 0x172   :  { %1792 = vst [vmem:[#allocation7 + $0xb0] sm:$0xff] %v1724_v4  }
 0x174   :  { %v647_v7 = vpop.f32.mrb[28].mxu0  ;;  %v2210_v8 = vpop.f32.mrb[28].mxu1 }
 0x175   :  { %v1179_v9 = vadd.f32 %v1178_v63, %v647_v7  ;;  %v1244_v10 = vmul.f32 %v647_v7, %v647_v7  ;;  %v649_v11 = vpop.f32.mrb[29].mxu0  ;;  %v777_v12 = vpop.f32.mrb[29].mxu1 }
 0x176   :  { %v650_v13 = vpop.f32.mrb[30].mxu0  ;;  %v2212_v14 = vpop.f32.mrb[30].mxu1 }
 0x177   :  { %v1307_v15 = vadd.f32 %v1306_v5, %v1244_v10  ;;  %v1649_v17 = vpack.c.bf16 %v650_v13, %v647_v7  ;;  %v1180_v19 = vadd.f32 %v1179_v9, %v650_v13  ;;  %v1245_v20 = vmul.f32 %v650_v13, %v650_v13  ;;  %v652_v21 = vpop.f32.mrb[31].mxu0  ;;  %v780_v22 = vpop.f32.mrb[31].mxu1 }
 0x178   :  { %v1729_v25 = vpack.c.bf16 %v2212_v14, %v2210_v8 }
 0x179   :  { %1777 = vst [vmem:[#allocation7 + $0x38] sm:$0xff] %v1649_v17   ;;  %v1308_v26 = vadd.f32 %v1307_v15, %v1245_v20 }
 0x17a   :  { %1793 = vst [vmem:[#allocation7 + $0xb8] sm:$0xff] %v1729_v25  }
 0x17c   :  { %v655_v27 = vpop.f32.mrb[32].mxu0  ;;  %v2216_v28 = vpop.f32.mrb[32].mxu1 }
 0x17d   :  { %v1181_v29 = vadd.f32 %v1180_v19, %v655_v27  ;;  %v1246_v30 = vmul.f32 %v655_v27, %v655_v27  ;;  %v657_v31 = vpop.f32.mrb[33].mxu0  ;;  %v785_v33 = vpop.f32.mrb[33].mxu1 }
 0x17e   :  { %v658_v34 = vpop.f32.mrb[34].mxu0  ;;  %v2218_v36 = vpop.f32.mrb[34].mxu1 }
 0x17f   :  { %v1309_v37 = vadd.f32 %v1308_v26, %v1246_v30  ;;  %v1654_v39 = vpack.c.bf16 %v658_v34, %v655_v27  ;;  %v1182_v40 = vadd.f32 %v1181_v29, %v658_v34  ;;  %v1247_v41 = vmul.f32 %v658_v34, %v658_v34  ;;  %v660_v43 = vpop.f32.mrb[35].mxu0  ;;  %v788_v44 = vpop.f32.mrb[35].mxu1 }
 0x180   :  { %v1734_v45 = vpack.c.bf16 %v2218_v36, %v2216_v28 }
 0x181   :  { %1778 = vst [vmem:[#allocation7 + $0x40] sm:$0xff] %v1654_v39   ;;  %v1310_v46 = vadd.f32 %v1309_v37, %v1247_v41 }
 0x182   :  { %1794 = vst [vmem:[#allocation7 + $0xc0] sm:$0xff] %v1734_v45  }
 0x184   :  { %v663_v47 = vpop.f32.mrb[36].mxu0  ;;  %v2222_v49 = vpop.f32.mrb[36].mxu1 }
 0x185   :  { %v1183_v50 = vadd.f32 %v1182_v40, %v663_v47  ;;  %v1248_v51 = vmul.f32 %v663_v47, %v663_v47  ;;  %v665_v52 = vpop.f32.mrb[37].mxu0  ;;  %v793_v55 = vpop.f32.mrb[37].mxu1 }
 0x186   :  { %v666_v56 = vpop.f32.mrb[38].mxu0  ;;  %v2224_v57 = vpop.f32.mrb[38].mxu1 }
 0x187   :  { %v1311_v58 = vadd.f32 %v1310_v46, %v1248_v51  ;;  %v1659_v59 = vpack.c.bf16 %v666_v56, %v663_v47  ;;  %v1184_v61 = vadd.f32 %v1183_v50, %v666_v56  ;;  %v1249_v62 = vmul.f32 %v666_v56, %v666_v56  ;;  %v668_v63 = vpop.f32.mrb[39].mxu0  ;;  %v796_v1 = vpop.f32.mrb[39].mxu1 }
 0x188   :  { %v1739_v2 = vpack.c.bf16 %v2224_v57, %v2222_v49 }
 0x189   :  { %1779 = vst [vmem:[#allocation7 + $0x48] sm:$0xff] %v1659_v59   ;;  %v1312_v3 = vadd.f32 %v1311_v58, %v1249_v62 }
 0x18a   :  { %1795 = vst [vmem:[#allocation7 + $0xc8] sm:$0xff] %v1739_v2  }
 0x18c   :  { %v671_v4 = vpop.f32.mrb[40].mxu0  ;;  %v2228_v5 = vpop.f32.mrb[40].mxu1 }
 0x18d   :  { %v1185_v7 = vadd.f32 %v1184_v61, %v671_v4  ;;  %v1250_v9 = vmul.f32 %v671_v4, %v671_v4  ;;  %v673_v10 = vpop.f32.mrb[41].mxu0  ;;  %v801_v11 = vpop.f32.mrb[41].mxu1 }
 0x18e   :  { %v674_v12 = vpop.f32.mrb[42].mxu0  ;;  %v2230_v13 = vpop.f32.mrb[42].mxu1 }
 0x18f   :  { %v1313_v15 = vadd.f32 %v1312_v3, %v1250_v9  ;;  %v1664_v17 = vpack.c.bf16 %v674_v12, %v671_v4  ;;  %v1186_v19 = vadd.f32 %v1185_v7, %v674_v12  ;;  %v1251_v20 = vmul.f32 %v674_v12, %v674_v12  ;;  %v676_v21 = vpop.f32.mrb[43].mxu0  ;;  %v804_v22 = vpop.f32.mrb[43].mxu1 }
 0x190   :  { %v1744_v25 = vpack.c.bf16 %v2230_v13, %v2228_v5 }
 0x191   :  { %1780 = vst [vmem:[#allocation7 + $0x50] sm:$0xff] %v1664_v17   ;;  %v1314_v26 = vadd.f32 %v1313_v15, %v1251_v20 }
 0x192   :  { %1796 = vst [vmem:[#allocation7 + $0xd0] sm:$0xff] %v1744_v25  }
 0x194   :  { %v679_v27 = vpop.f32.mrb[44].mxu0  ;;  %v2234_v29 = vpop.f32.mrb[44].mxu1 }
 0x195   :  { %v1187_v30 = vadd.f32 %v1186_v19, %v679_v27  ;;  %v1252_v31 = vmul.f32 %v679_v27, %v679_v27  ;;  %v681_v33 = vpop.f32.mrb[45].mxu0  ;;  %v809_v34 = vpop.f32.mrb[45].mxu1 }
 0x196   :  { %v682_v37 = vpop.f32.mrb[46].mxu0  ;;  %v2236_v39 = vpop.f32.mrb[46].mxu1 }
 0x197   :  { %v1315_v40 = vadd.f32 %v1314_v26, %v1252_v31  ;;  %v1669_v41 = vpack.c.bf16 %v682_v37, %v679_v27  ;;  %v1188_v43 = vadd.f32 %v1187_v30, %v682_v37  ;;  %v1253_v44 = vmul.f32 %v682_v37, %v682_v37  ;;  %v684_v45 = vpop.f32.mrb[47].mxu0  ;;  %v812_v46 = vpop.f32.mrb[47].mxu1 }
 0x198   :  { %v1749_v47 = vpack.c.bf16 %v2236_v39, %v2234_v29 }
 0x199   :  { %1781 = vst [vmem:[#allocation7 + $0x58] sm:$0xff] %v1669_v41   ;;  %v1316_v50 = vadd.f32 %v1315_v40, %v1253_v44 }
 0x19a   :  { %1797 = vst [vmem:[#allocation7 + $0xd8] sm:$0xff] %v1749_v47  }
 0x19c   :  { %v687_v51 = vpop.f32.mrb[48].mxu0  ;;  %v2240_v52 = vpop.f32.mrb[48].mxu1 }
 0x19d   :  { %v1189_v55 = vadd.f32 %v1188_v43, %v687_v51  ;;  %v1254_v56 = vmul.f32 %v687_v51, %v687_v51  ;;  %v689_v58 = vpop.f32.mrb[49].mxu0  ;;  %v817_v59 = vpop.f32.mrb[49].mxu1 }
 0x19e   :  { %v690_v61 = vpop.f32.mrb[50].mxu0  ;;  %v2242_v62 = vpop.f32.mrb[50].mxu1 }
 0x19f   :  { %v1317_v63 = vadd.f32 %v1316_v50, %v1254_v56  ;;  %v1674_v1 = vpack.c.bf16 %v690_v61, %v687_v51  ;;  %v1190_v2 = vadd.f32 %v1189_v55, %v690_v61  ;;  %v1255_v3 = vmul.f32 %v690_v61, %v690_v61  ;;  %v692_v4 = vpop.f32.mrb[51].mxu0  ;;  %v820_v7 = vpop.f32.mrb[51].mxu1 }
 0x1a0   :  { %v1754_v9 = vpack.c.bf16 %v2242_v62, %v2240_v52 }
 0x1a1   :  { %1782 = vst [vmem:[#allocation7 + $0x60] sm:$0xff] %v1674_v1   ;;  %v1318_v10 = vadd.f32 %v1317_v63, %v1255_v3 }
 0x1a2   :  { %1798 = vst [vmem:[#allocation7 + $0xe0] sm:$0xff] %v1754_v9  }
 0x1a4   :  { %v695_v11 = vpop.f32.mrb[52].mxu0  ;;  %v2246_v12 = vpop.f32.mrb[52].mxu1 }
 0x1a5   :  { %v1191_v15 = vadd.f32 %v1190_v2, %v695_v11  ;;  %v1256_v17 = vmul.f32 %v695_v11, %v695_v11  ;;  %v697_v19 = vpop.f32.mrb[53].mxu0  ;;  %v825_v20 = vpop.f32.mrb[53].mxu1 }
 0x1a6   :  { %v698_v21 = vpop.f32.mrb[54].mxu0  ;;  %v2248_v22 = vpop.f32.mrb[54].mxu1 }
 0x1a7   :  { %v1319_v25 = vadd.f32 %v1318_v10, %v1256_v17  ;;  %v1679_v26 = vpack.c.bf16 %v698_v21, %v695_v11  ;;  %v1192_v27 = vadd.f32 %v1191_v15, %v698_v21  ;;  %v1257_v30 = vmul.f32 %v698_v21, %v698_v21  ;;  %v700_v31 = vpop.f32.mrb[55].mxu0  ;;  %v828_v33 = vpop.f32.mrb[55].mxu1 }
 0x1a8   :  { %v1759_v34 = vpack.c.bf16 %v2248_v22, %v2246_v12 }
 0x1a9   :  { %1783 = vst [vmem:[#allocation7 + $0x68] sm:$0xff] %v1679_v26   ;;  %v1320_v37 = vadd.f32 %v1319_v25, %v1257_v30  ;;  %v1262_v30 = vmul.f32 %v2168_v18, %v2168_v18 }
 0x1aa   :  { %1799 = vst [vmem:[#allocation7 + $0xe8] sm:$0xff] %v1759_v34   ;;  %v1263_v34 = vmul.f32 %v2170_v23, %v2170_v23 }
 0x1ac   :  { %v703_v40 = vpop.f32.mrb[56].mxu0  ;;  %v2252_v41 = vpop.f32.mrb[56].mxu1 }
 0x1ad   :  { %v1193_v43 = vadd.f32 %v1192_v27, %v703_v40  ;;  %v1258_v44 = vmul.f32 %v703_v40, %v703_v40  ;;  %v705_v45 = vpop.f32.mrb[57].mxu0  ;;  %v833_v46 = vpop.f32.mrb[57].mxu1 }
 0x1ae   :  { %v706_v47 = vpop.f32.mrb[58].mxu0  ;;  %v2254_v50 = vpop.f32.mrb[58].mxu1 }
 0x1af   :  { %v1321_v51 = vadd.f32 %v1320_v37, %v1258_v44  ;;  %v1684_v55 = vpack.c.bf16 %v706_v47, %v703_v40  ;;  %v1194_v56 = vadd.f32 %v1193_v43, %v706_v47  ;;  %v1259_v58 = vmul.f32 %v706_v47, %v706_v47  ;;  %v708_v59 = vpop.f32.mrb[59].mxu0  ;;  %v836_v61 = vpop.f32.mrb[59].mxu1 }
 0x1b0   :  { %v1764_v63 = vpack.c.bf16 %v2254_v50, %v2252_v41 }
 0x1b1   :  { %1784 = vst [vmem:[#allocation7 + $0x70] sm:$0xff] %v1684_v55   ;;  %v1322_v1 = vadd.f32 %v1321_v51, %v1259_v58 }
 0x1b2   :  { %1800 = vst [vmem:[#allocation7 + $0xf0] sm:$0xff] %v1764_v63  }
 0x1b4   :  { %v711_v2 = vpop.f32.mrb[60].mxu0  ;;  %v2258_v3 = vpop.f32.mrb[60].mxu1 }
 0x1b5   :  { %v1195_v4 = vadd.f32 %v1194_v56, %v711_v2  ;;  %v1260_v7 = vmul.f32 %v711_v2, %v711_v2  ;;  %v713_v9 = vpop.f32.mrb[61].mxu0  ;;  %v841_v10 = vpop.f32.mrb[61].mxu1 }
 0x1b6   :  { %v714_v11 = vpop.f32.mrb[62].mxu0  ;;  %v2260_v15 = vpop.f32.mrb[62].mxu1 }
 0x1b7   :  { %v1323_v17 = vadd.f32 %v1322_v1, %v1260_v7  ;;  %v1689_v19 = vpack.c.bf16 %v714_v11, %v711_v2  ;;  %v1196_v20 = vadd.f32 %v1195_v4, %v714_v11  ;;  %v1261_v21 = vmul.f32 %v714_v11, %v714_v11  ;;  %v716_v25 = vpop.f32.mrb[63].mxu0  ;;  %v844_v26 = vpop.f32.mrb[63].mxu1 }
 0x1b8   :  { %v1769_v27 = vpack.c.bf16 %v2260_v15, %v2258_v3 }
 0x1b9   :  { %1785 = vst [vmem:[#allocation7 + $0x78] sm:$0xff] %v1689_v19   ;;  %v1197_v31 = vadd.f32 %v1196_v20, %v2168_v18  ;;  %v1324_v33 = vadd.f32 %v1323_v17, %v1261_v21 }
 0x1ba   :  { %1801 = vst [vmem:[#allocation7 + $0xf8] sm:$0xff] %v1769_v27  }
 0x1bb   :  { %v1198_v37 = vadd.f32 %v1197_v31, %v2170_v23  ;;  %v1325_v40 = vadd.f32 %v1324_v33, %v1262_v30 }
 0x1bc   :  { %2011 = shalt.err (!%p2008_p6)
}
 0x1bd   :  { %s2012_s20 = scalar_lea.hbm %s2401_s2, 4096 }
 0x1be   :  { %p2013_p7 = scmp.ne.s32.totalorder %s2401_s2, %s2012_s20  ;;  %p2016_p8 = scmp.lt.u32.totalorder %s2012_s20, %s2401_s2 }
 0x1c0   :  { %p2018_p9 = pnand %p2016_p8, %p2013_p7 }
 0x1c2   :  { %2021 = shalt.err (!%p2018_p9)
}
 0x1c3   :  { %1369 = dma.vmem_to_hbm [thread:$0]  %s1364_s16, 4096, %s2401_s2, [#allocation4], %s2078_s0, %s2078_s0, %s2079_s13   ;;  %v1264_v18 = vmul.f32 %v2174_v32, %v2174_v32  ;;  %v1199_v23 = vadd.f32 %v1198_v37, %v2174_v32  ;;  %v1326_v43 = vadd.f32 %v1325_v40, %v1263_v34  ;;  %v1265_v44 = vmul.f32 %v2176_v38, %v2176_v38 }
 0x1c4   :  { %v1266_v47 = vmul.f32 %v2180_v48, %v2180_v48  ;;  %v1267_v56 = vmul.f32 %v2182_v54, %v2182_v54  ;;  %v1268_v32 = vmul.f32 %v2186_v0, %v2186_v0  ;;  %v1278_v37 = vmul.f32 %v2216_v28, %v2216_v28  ;;  %s2082_s2 = smov [#allocation8]   ;;  %s2083_s28 = smov [#allocation10]  }
 0x1c5   :  { %v1200_v45 = vadd.f32 %v1199_v23, %v2176_v38  ;;  %v1327_v46 = vadd.f32 %v1326_v43, %v1264_v18  ;;  %v1269_v38 = vmul.f32 %v2188_v6, %v2188_v6  ;;  %v1279_v23 = vmul.f32 %v2218_v36, %v2218_v36  ;;  %s1376_s27 = sshll.u32 %s2082_s2, 4  ;;  %s1386_s29 = sshll.u32 %s2083_s28, 4  ;;  %s1377_s27 = int_to_ptr.vmem [resolvable:$true] %s1376_s27  ;;  %s1387_s29 = int_to_ptr.vmem [resolvable:$true] %s1386_s29 }
 0x1c6   :  { %s2022_s30 = scalar_lea.vmem %s1377_s27, 128  ;;  %p2027_p11 = scmp.lt.s32.totalorder %s1377_s27, %s1377_s27 }
 0x1c7   :  { %v1201_v51 = vadd.f32 %v1200_v45, %v2180_v48  ;;  %v1328_v55 = vadd.f32 %v1327_v46, %v1265_v44  ;;  %v1270_v48 = vmul.f32 %v2192_v16, %v2192_v16  ;;  %v1280_v44 = vmul.f32 %v2222_v49, %v2222_v49  ;;  %p2023_p10 = scmp.ne.s32.totalorder %s1377_s27, %s2022_s30  ;;  %p2028_p12 = scmp.lt.s32.totalorder %s2022_s30, %s2022_s30 }
 0x1c8   :  { %v1281_v46 = vmul.f32 %v2224_v57, %v2224_v57 }
 0x1c9   :  { %v1202_v58 = vadd.f32 %v1201_v51, %v2182_v54  ;;  %v1329_v59 = vadd.f32 %v1328_v55, %v1266_v47  ;;  %v1271_v54 = vmul.f32 %v2194_v24, %v2194_v24  ;;  %v1282_v51 = vmul.f32 %v2228_v5, %v2228_v5  ;;  %p2029_p13 = por %p2028_p12, %p2027_p11 }
 0x1cb   :  { %v1203_v61 = vadd.f32 %v1202_v58, %v2186_v0  ;;  %v1330_v63 = vadd.f32 %v1329_v59, %v1267_v56  ;;  %v1272_v0 = vmul.f32 %v2198_v35, %v2198_v35  ;;  %v1283_v56 = vmul.f32 %v2230_v13, %v2230_v13  ;;  %p2030_p0 = pnand %p2029_p13, %p2023_p10 }
 0x1cc   :  { %v1284_v59 = vmul.f32 %v2234_v29, %v2234_v29 }
 0x1cd   :  { %v1204_v1 = vadd.f32 %v1203_v61, %v2188_v6  ;;  %v1331_v2 = vadd.f32 %v1330_v63, %v1268_v32  ;;  %v1273_v6 = vmul.f32 %v2200_v42, %v2200_v42  ;;  %v1285_v61 = vmul.f32 %v2236_v39, %v2236_v39 }
 0x1cf   :  { %v1332_v4 = vadd.f32 %v1331_v2, %v1269_v38  ;;  %v1205_v7 = vadd.f32 %v1204_v1, %v2192_v16  ;;  %v1274_v16 = vmul.f32 %v2204_v53, %v2204_v53  ;;  %v1286_v38 = vmul.f32 %v2240_v52, %v2240_v52 }
 0x1d0   :  { %v1287_v2 = vmul.f32 %v2242_v62, %v2242_v62 }
 0x1d1   :  { %v1206_v9 = vadd.f32 %v1205_v7, %v2194_v24  ;;  %v1333_v10 = vadd.f32 %v1332_v4, %v1270_v48  ;;  %v1275_v24 = vmul.f32 %v2206_v60, %v2206_v60  ;;  %v1288_v4 = vmul.f32 %v2246_v12, %v2246_v12 }
 0x1d3   :  { %v1207_v11 = vadd.f32 %v1206_v9, %v2198_v35  ;;  %v1334_v17 = vadd.f32 %v1333_v10, %v1271_v54  ;;  %v1276_v35 = vmul.f32 %v2210_v8, %v2210_v8  ;;  %v1289_v54 = vmul.f32 %v2248_v22, %v2248_v22 }
 0x1d4   :  { %v1290_v10 = vmul.f32 %v2252_v41, %v2252_v41 }
 0x1d5   :  { %v1208_v19 = vadd.f32 %v1207_v11, %v2200_v42  ;;  %v1335_v20 = vadd.f32 %v1334_v17, %v1272_v0  ;;  %v1277_v42 = vmul.f32 %v2212_v14, %v2212_v14  ;;  %v1291_v11 = vmul.f32 %v2254_v50, %v2254_v50 }
 0x1d7   :  { %v1209_v21 = vadd.f32 %v1208_v19, %v2204_v53  ;;  %v1336_v25 = vadd.f32 %v1335_v20, %v1273_v6 }
 0x1d9   :  { %v1210_v26 = vadd.f32 %v1209_v21, %v2206_v60  ;;  %v1337_v27 = vadd.f32 %v1336_v25, %v1274_v16 }
 0x1db   :  { %v1211_v30 = vadd.f32 %v1210_v26, %v2210_v8  ;;  %v1338_v31 = vadd.f32 %v1337_v27, %v1275_v24 }
 0x1dd   :  { %v1212_v33 = vadd.f32 %v1211_v30, %v2212_v14  ;;  %v1339_v34 = vadd.f32 %v1338_v31, %v1276_v35 }
 0x1df   :  { %v1213_v53 = vadd.f32 %v1212_v33, %v2216_v28  ;;  %v1340_v40 = vadd.f32 %v1339_v34, %v1277_v42 }
 0x1e1   :  { %v1341_v60 = vadd.f32 %v1340_v40, %v1278_v37  ;;  %v1214_v18 = vadd.f32 %v1213_v53, %v2218_v36 }
 0x1e3   :  { %v1342_v8 = vadd.f32 %v1341_v60, %v1279_v23  ;;  %v1215_v43 = vadd.f32 %v1214_v18, %v2222_v49 }
 0x1e5   :  { %v1343_v14 = vadd.f32 %v1342_v8, %v1280_v44  ;;  %v1216_v45 = vadd.f32 %v1215_v43, %v2224_v57 }
 0x1e7   :  { %v1344_v28 = vadd.f32 %v1343_v14, %v1281_v46  ;;  %v1217_v47 = vadd.f32 %v1216_v45, %v2228_v5 }
 0x1e9   :  { %v1345_v55 = vadd.f32 %v1344_v28, %v1282_v51  ;;  %v1218_v36 = vadd.f32 %v1217_v47, %v2230_v13 }
 0x1eb   :  { %v1346_v58 = vadd.f32 %v1345_v55, %v1283_v56  ;;  %v1219_v49 = vadd.f32 %v1218_v36, %v2234_v29 }
 0x1ed   :  { %v1347_v32 = vadd.f32 %v1346_v58, %v1284_v59  ;;  %v1220_v57 = vadd.f32 %v1219_v49, %v2236_v39 }
 0x1ef   :  { %v1348_v63 = vadd.f32 %v1347_v32, %v1285_v61  ;;  %v1221_v5 = vadd.f32 %v1220_v57, %v2240_v52 }
 0x1f1   :  { %v1349_v1 = vadd.f32 %v1348_v63, %v1286_v38  ;;  %v1222_v13 = vadd.f32 %v1221_v5, %v2242_v62 }
 0x1f3   :  { %v1350_v48 = vadd.f32 %v1349_v1, %v1287_v2  ;;  %v1223_v29 = vadd.f32 %v1222_v13, %v2246_v12  ;;  %v1292_v12 = vmul.f32 %v2258_v3, %v2258_v3 }
 0x1f5   :  { %v1351_v7 = vadd.f32 %v1350_v48, %v1288_v4  ;;  %v1224_v39 = vadd.f32 %v1223_v29, %v2248_v22 }
 0x1f7   :  { %v1352_v9 = vadd.f32 %v1351_v7, %v1289_v54  ;;  %v1225_v52 = vadd.f32 %v1224_v39, %v2252_v41  ;;  %v1293_v41 = vmul.f32 %v2260_v15, %v2260_v15 }
 0x1f9   :  { %v1353_v0 = vadd.f32 %v1352_v9, %v1290_v10  ;;  %v1226_v62 = vadd.f32 %v1225_v52, %v2254_v50 }
 0x1fb   :  { %v1354_v17 = vadd.f32 %v1353_v0, %v1291_v11  ;;  %v1227_v22 = vadd.f32 %v1226_v62, %v2258_v3 }
 0x1fd   :  { %v1355_v6 = vadd.f32 %v1354_v17, %v1292_v12  ;;  %v1228_v19 = vadd.f32 %v1227_v22, %v2260_v15 }
 0x1ff   :  { %1229 = vst [vmem:[#allocation8] sm:$0xff] %v1228_v19  ;;  %v1356_v20 = vadd.f32 %v1355_v6, %v1293_v41 }
 0x200   :  { %2033 = shalt.err (!%p2030_p0)
}
 0x201   :  { %s2034_s7 = scalar_lea.hbm %s2402_s3, 128 }
 0x202   :  { %p2035_p1 = scmp.ne.s32.totalorder %s2402_s3, %s2034_s7  ;;  %p2038_p2 = scmp.lt.u32.totalorder %s2034_s7, %s2402_s3 }
 0x204   :  { %p2040_p3 = pnand %p2038_p2, %p2035_p1 }
 0x206   :  { %2043 = shalt.err (!%p2040_p3)
}
 0x207   :  { %1379 = dma.vmem_to_hbm [thread:$0]  %s1377_s27, 128, %s2402_s3, [#allocation9]   ;;  %1357 = vst [vmem:[#allocation10] sm:$0xff] %v1356_v20 }
 0x208   :  { %s2044_s13 = scalar_lea.vmem %s1387_s29, 128  ;;  %p2049_p5 = scmp.lt.s32.totalorder %s1387_s29, %s1387_s29 }
 0x209   :  { %p2045_p4 = scmp.ne.s32.totalorder %s1387_s29, %s2044_s13  ;;  %p2050_p6 = scmp.lt.s32.totalorder %s2044_s13, %s2044_s13 }
 0x20b   :  { %p2051_p7 = por %p2050_p6, %p2049_p5 }
 0x20d   :  { %p2052_p8 = pnand %p2051_p7, %p2045_p4 }
 0x20f   :  { %2055 = shalt.err (!%p2052_p8)
}
 0x210   :  { %s2056_s1 = scalar_lea.hbm %s2403_s4, 128 }
 0x211   :  { %p2057_p9 = scmp.ne.s32.totalorder %s2403_s4, %s2056_s1  ;;  %p2060_p10 = scmp.lt.u32.totalorder %s2056_s1, %s2403_s4 }
 0x213   :  { %p2062_p11 = pnand %p2060_p10, %p2057_p9 }
 0x215   :  { %2065 = shalt.err (!%p2062_p11)
}
 0x216   :  { %1389 = dma.vmem_to_hbm [thread:$0]  %s1387_s29, 128, %s2403_s4, [#allocation9]  }
 0x217   :  { %2070 = dma.done.wait [#allocation4], 4096  }
 0x218   :  { %2071 = vsyncadd [#allocation4], 4294963200 }
 0x219   :  { %2072 = dma.done.wait [#allocation9], 256  }
 0x21a   :  { %2073 = vsyncadd [#allocation9], 4294967040 }
 0x21b   :  { %1399 = vsyncpa [#allocation3], 1 }
 0x21c   :  { %1400 = vsyncpa [#allocation6], 1 }
 0x21d   :  { %1401 = vsyncpa [#allocation4], 1 }
 0x21e   :  { %1402 = vsyncpa [#allocation9], 1 }

</bundles_post_ra>
